<compile_context>
chip_gen: v7x
topology: tpu7x:2x2x1
jax: 0.10.0
libtpu: 0.0.40
codegen_flags: <defaults>
</compile_context>

<pallas_src>
import jax
import jax.numpy as jnp
from jax.experimental import pallas as pl
from jax.experimental.pallas import tpu as pltpu

_LANES = 128
_MAX_TILE_ROWS = 1024  # (1024,128) f32 block = 512 KiB; 4 streams x 2 bufs = 4 MiB VMEM


def _round_up(x, m):
    return ((x + m - 1) // m) * m


def _cdiv(a, b):
    return (a + b - 1) // b


def _make_loss_kernel(loss_type, label_const, has_label, has_weight, has_mask,
                      n_valid, tile_rows, steps, need_tail_mask):
    """Build a specialized kernel for the given combination of inputs."""

    def kernel(*refs):
        idx = 0
        pred_ref = refs[idx]; idx += 1
        label_ref = None
        if has_label:
            label_ref = refs[idx]; idx += 1
        w_ref = None
        if has_weight:
            w_ref = refs[idx]; idx += 1
        m_ref = None
        if has_mask:
            m_ref = refs[idx]; idx += 1
        num_ref = refs[idx]
        den_ref = refs[idx + 1]

        c = pl.program_id(0)   # parallel (core) axis
        i = pl.program_id(1)   # arbitrary (reduction) axis

        @pl.when(i == 0)
        def _():
            num_ref[...] = jnp.zeros_like(num_ref)
            den_ref[...] = jnp.zeros_like(den_ref)

        p = pred_ref[...].astype(jnp.float32)
        if has_label:
            y = label_ref[...].astype(jnp.float32)
        else:
            y = jnp.float32(label_const)

        if loss_type == "l1":
            loss = jnp.abs(p - y)
        elif loss_type == "mse":
            d = p - y
            loss = d * d
        elif loss_type == "bce":
            # binary_cross_entropy_with_logits, reduction='none' (stable form)
            loss = jnp.maximum(p, 0.0) - p * y + jnp.log1p(jnp.exp(-jnp.abs(p)))
        else:
            raise ValueError(loss_type)

        if has_weight or has_mask:
            wm = None
            if has_weight:
                wm = w_ref[...].astype(jnp.float32)
            if has_mask:
                mv = m_ref[...].astype(jnp.float32)
                wm = mv if wm is None else wm * mv
            # padding was zero-filled in weight/mask, so it contributes nothing
            num_ref[...] += loss * wm
            den_ref[...] += wm
        elif need_tail_mask:
            # no weight/mask streams -> mask out the zero-padded tail in-kernel
            base = (c * steps + i) * (tile_rows * _LANES)
            ridx = jax.lax.broadcasted_iota(jnp.int32, (tile_rows, _LANES), 0)
            lidx = jax.lax.broadcasted_iota(jnp.int32, (tile_rows, _LANES), 1)
            valid = ((base + ridx * _LANES + lidx) < n_valid).astype(jnp.float32)
            num_ref[...] += loss * valid
            den_ref[...] += valid
        else:
            num_ref[...] += loss
            den_ref[...] += jnp.float32(1.0)

    return kernel


def _flatten_pad(x, n_total):
    """Flatten to 1D, zero-pad to n_total elements, reshape to [rows, 128]."""
    flat = jnp.ravel(x)
    pad = n_total - flat.shape[0]
    if pad:
        flat = jnp.pad(flat, (0, pad))
    return flat.reshape(-1, _LANES)


def _prep(x, shape):
    """Broadcast to pred's shape; keep floating dtypes (bf16 stays bf16)."""
    x = jnp.asarray(x)
    if not jnp.issubdtype(x.dtype, jnp.floating):
        x = x.astype(jnp.float32)
    return jnp.broadcast_to(x, shape)


def _aggregate_loss_pallas(loss_type, pred, label=0.0, weight=None, mask=None):
    """Pallas implementation of Model.{L1,MSE,BCE}_loss + aggregate_loss."""
    pred = jnp.asarray(pred)
    if not jnp.issubdtype(pred.dtype, jnp.floating):
        pred = pred.astype(jnp.float32)
    shape = pred.shape
    n = int(pred.size)

    label_is_tensor = not isinstance(label, (int, float))
    label_const = float(label) if not label_is_tensor else 0.0
    has_weight = weight is not None
    has_mask = mask is not None

    # ---- static tiling decision (pure Python-int math) ----------------------
    rows = _round_up(_cdiv(n, _LANES), 8)
    if rows <= _MAX_TILE_ROWS:
        n_cores, steps, tile_rows = 1, 1, rows
    else:
        n_cores = 2  # shard rows across TensorCores (v7x); harmless on 1-TC chips
        rpc = _cdiv(rows, n_cores)
        steps = _cdiv(rpc, _MAX_TILE_ROWS)
        tile_rows = _round_up(_cdiv(rpc, steps), 8)
    total_rows = n_cores * steps * tile_rows
    n_total = total_rows * _LANES
    has_pad = n_total != n
    need_tail_mask = has_pad and not (has_weight or has_mask)

    # ---- build only the input streams that are actually needed --------------
    inputs = [_flatten_pad(pred, n_total)]
    if label_is_tensor:
        inputs.append(_flatten_pad(_prep(label, shape), n_total))
    if has_weight:
        inputs.append(_flatten_pad(_prep(weight, shape), n_total))
    if has_mask:
        inputs.append(_flatten_pad(_prep(mask, shape), n_total))  # pad=0 -> excluded

    in_spec = pl.BlockSpec((tile_rows, _LANES), lambda c, i: (c * steps + i, 0))
    out_spec = pl.BlockSpec((tile_rows, _LANES), lambda c, i: (c, 0))

    kernel = _make_loss_kernel(loss_type, label_const, label_is_tensor,
                               has_weight, has_mask, n, tile_rows, steps,
                               need_tail_mask)

    num_acc, den_acc = pl.pallas_call(
        kernel,
        out_shape=(
            jax.ShapeDtypeStruct((n_cores * tile_rows, _LANES), jnp.float32),
            jax.ShapeDtypeStruct((n_cores * tile_rows, _LANES), jnp.float32),
        ),
        grid_spec=pltpu.PrefetchScalarGridSpec(
            num_scalar_prefetch=0,
            grid=(n_cores, steps),
            in_specs=[in_spec] * len(inputs),
            out_specs=(out_spec, out_spec),
        ),
        compiler_params=pltpu.CompilerParams(
            dimension_semantics=("parallel", "arbitrary")),
    )(*inputs)

    # Tiny final cross-lane reduce of the per-lane partial sums (plain XLA).
    num = jnp.sum(num_acc)
    den = jnp.sum(den_acc)

    if has_mask:
        # PyTorch: return 0 iff mask.sum() == 0 (checked on the ORIGINAL mask);
        # guard the denominator so the dead branch never produces inf/nan.
        msum = jnp.sum(jnp.asarray(mask).astype(jnp.float32))
        den_safe = jnp.where(msum > 0, den, jnp.float32(1.0))
        return jnp.where(msum > 0, num / den_safe, jnp.float32(0.0))
    return num / den


# Public API mirroring the PyTorch Model methods ------------------------------
def L1_loss(pred, label=0.0, weight=None, mask=None):
    return _aggregate_loss_pallas("l1", pred, label, weight, mask)


def MSE_loss(pred, label=0.0, weight=None, mask=None):
    return _aggregate_loss_pallas("mse", pred, label, weight, mask)


def BCE_loss(pred, label, weight=None, mask=None):
    return _aggregate_loss_pallas("bce", pred, label, weight, mask)


# Pure-JAX references for verification ----------------------------------------
def _ref_aggregate(loss, weight, mask):
    if mask is not None:
        m = jnp.broadcast_to(mask, loss.shape).astype(jnp.float32)
        if jnp.sum(m) == 0:
            return jnp.float32(0.0)
        if weight is not None:
            w = jnp.broadcast_to(weight, loss.shape)
            return jnp.sum(loss * w * m) / jnp.sum(w * m)
        return jnp.sum(loss * m) / jnp.sum(m)
    if weight is not None:
        w = jnp.broadcast_to(weight, loss.shape)
        return jnp.sum(loss * w) / jnp.sum(w)
    return jnp.mean(loss)


def _ref_l1(pred, label=0.0, weight=None, mask=None):
    return _ref_aggregate(jnp.abs(pred - label), weight, mask)


def _ref_mse(pred, label=0.0, weight=None, mask=None):
    return _ref_aggregate((pred - label) ** 2, weight, mask)


def _ref_bce(pred, label, weight=None, mask=None):
    label = jnp.broadcast_to(label, pred.shape)
    loss = jnp.maximum(pred, 0.0) - pred * label + jnp.log1p(jnp.exp(-jnp.abs(pred)))
    return _ref_aggregate(loss, weight, mask)


if __name__ == "__main__":
    key = jax.random.PRNGKey(0)
    k1, k2, k3, k4, k5, k6 = jax.random.split(key, 6)

    # Small shapes consistent with typical NCHW usage of this base class.
    pred = jax.random.normal(k1, (2, 4, 16, 16), jnp.float32)
    label = jax.random.normal(k2, (2, 4, 16, 16), jnp.float32)
    weight = jax.random.uniform(k3, (2, 4, 16, 16), jnp.float32) + 0.1
    mask = (jax.random.uniform(k4, (2, 1, 16, 16)) > 0.5).astype(jnp.float32)
    bce_label = (label > 0).astype(jnp.float32)

    # Medium shape exercising the 2-core grid + in-kernel tail-mask path.
    pred_m = jax.random.normal(k5, (3, 4, 96, 130), jnp.float32)
    label_m = jax.random.normal(k6, (3, 4, 96, 130), jnp.float32)

    checks = [
        (L1_loss(pred, label), _ref_l1(pred, label)),
        (L1_loss(pred), _ref_l1(pred, 0.0)),
        (L1_loss(pred, 0.0, weight=weight), _ref_l1(pred, 0.0, weight=weight)),
        (MSE_loss(pred, label, mask=mask), _ref_mse(pred, label, mask=mask)),
        (MSE_loss(pred, label, weight=weight, mask=mask),
         _ref_mse(pred, label, weight=weight, mask=mask)),
        (BCE_loss(pred, bce_label), _ref_bce(pred, bce_label)),
        (BCE_loss(pred, bce_label, weight=weight, mask=mask),
         _ref_bce(pred, bce_label, weight=weight, mask=mask)),
        # all-zero mask -> 0.0
        (MSE_loss(pred, label, mask=jnp.zeros_like(mask)), jnp.float32(0.0)),
        # multi-core / tail-mask paths
        (L1_loss(pred_m, label_m), _ref_l1(pred_m, label_m)),
        (MSE_loss(pred_m), _ref_mse(pred_m, 0.0)),
    ]

    ok = True
    for out, ref in checks:
        out = jax.block_until_ready(out)
        ref = jax.block_until_ready(ref)
        if not jnp.allclose(out, ref, rtol=1e-4, atol=1e-5):
            ok = False
            print("MISMATCH", float(out), float(ref))

    if ok:
        print("KERNEL_OK")
</pallas_src>

<mosaic_0001>
module attributes {stable_mosaic.version = 11 : i64} {
  func.func @kernel(%arg0: i32, %arg1: i32, %arg2: memref<16x128xf32, #tpu.memory_space<vmem>>, %arg3: memref<16x128xf32, #tpu.memory_space<vmem>>, %arg4: memref<16x128xf32, #tpu.memory_space<vmem>>, %arg5: memref<16x128xf32, #tpu.memory_space<vmem>>) attributes {dimension_semantics = [#tpu.dimension_semantics<parallel>, #tpu.dimension_semantics<arbitrary>], iteration_bounds = array<i64: 1, 1>, scalar_prefetch = 0 : i64, scratch_operands = 0 : i64, tpu.core_type = #tpu.core_type<tc>, window_params = [{transform_indices = @transform_0, window_bounds = array<i64: 16, 128>}, {transform_indices = @transform_1, window_bounds = array<i64: 16, 128>}, {transform_indices = @transform_2, window_bounds = array<i64: 16, 128>}, {transform_indices = @transform_3, window_bounds = array<i64: 16, 128>}]} {
    %c0_i32 = arith.constant 0 : i32
    %0 = arith.cmpi eq, %arg1, %c0_i32 : i32
    %1 = arith.extui %0 : i1 to i32
    %c0_i32_0 = arith.constant 0 : i32
    %2 = arith.cmpi ne, %1, %c0_i32_0 : i32
    scf.if %2 {
      %cst_12 = arith.constant 0.000000e+00 : f32
      %14 = vector.broadcast %cst_12 : f32 to vector<16x128xf32>
      %c0_13 = arith.constant 0 : index
      %c0_14 = arith.constant 0 : index
      %15 = vector.load %arg4[%c0_13, %c0_14] : memref<16x128xf32, #tpu.memory_space<vmem>>, vector<16x128xf32>
      tpu.vector_store %arg4[%c0_13, %c0_14], %14 {strides = array<i32>} : memref<16x128xf32, #tpu.memory_space<vmem>>, vector<16x128xf32>,
      %cst_15 = arith.constant 0.000000e+00 : f32
      %16 = vector.broadcast %cst_15 : f32 to vector<16x128xf32>
      %c0_16 = arith.constant 0 : index
      %c0_17 = arith.constant 0 : index
      %17 = vector.load %arg5[%c0_16, %c0_17] : memref<16x128xf32, #tpu.memory_space<vmem>>, vector<16x128xf32>
      tpu.vector_store %arg5[%c0_16, %c0_17], %16 {strides = array<i32>} : memref<16x128xf32, #tpu.memory_space<vmem>>, vector<16x128xf32>,
    } else {
    }
    %c0 = arith.constant 0 : index
    %c0_1 = arith.constant 0 : index
    %3 = vector.load %arg2[%c0, %c0_1] : memref<16x128xf32, #tpu.memory_space<vmem>>, vector<16x128xf32>
    %c0_2 = arith.constant 0 : index
    %c0_3 = arith.constant 0 : index
    %4 = vector.load %arg3[%c0_2, %c0_3] : memref<16x128xf32, #tpu.memory_space<vmem>>, vector<16x128xf32>
    %5 = arith.subf %3, %4 : vector<16x128xf32>
    %6 = math.absf %5 : vector<16x128xf32>
    %c0_4 = arith.constant 0 : index
    %c0_5 = arith.constant 0 : index
    %7 = vector.load %arg4[%c0_4, %c0_5] : memref<16x128xf32, #tpu.memory_space<vmem>>, vector<16x128xf32>
    %8 = arith.addf %7, %6 : vector<16x128xf32>
    %c0_6 = arith.constant 0 : index
    %c0_7 = arith.constant 0 : index
    %9 = vector.load %arg4[%c0_6, %c0_7] : memref<16x128xf32, #tpu.memory_space<vmem>>, vector<16x128xf32>
    tpu.vector_store %arg4[%c0_6, %c0_7], %8 {strides = array<i32>} : memref<16x128xf32, #tpu.memory_space<vmem>>, vector<16x128xf32>,
    %c0_8 = arith.constant 0 : index
    %c0_9 = arith.constant 0 : index
    %10 = vector.load %arg5[%c0_8, %c0_9] : memref<16x128xf32, #tpu.memory_space<vmem>>, vector<16x128xf32>
    %cst = arith.constant 1.000000e+00 : f32
    %11 = vector.broadcast %cst : f32 to vector<16x128xf32>
    %12 = arith.addf %10, %11 : vector<16x128xf32>
    %c0_10 = arith.constant 0 : index
    %c0_11 = arith.constant 0 : index
    %13 = vector.load %arg5[%c0_10, %c0_11] : memref<16x128xf32, #tpu.memory_space<vmem>>, vector<16x128xf32>
    tpu.vector_store %arg5[%c0_10, %c0_11], %12 {strides = array<i32>} : memref<16x128xf32, #tpu.memory_space<vmem>>, vector<16x128xf32>,
    return
  }
  func.func @transform_0(%arg0: i32, %arg1: i32) -> (i32, i32) {
    %c1_i32 = arith.constant 1 : i32
    %0 = arith.muli %arg0, %c1_i32 : i32
    %1 = arith.addi %0, %arg1 : i32
    %c0_i32 = arith.constant 0 : i32
    %c0_i32_0 = arith.constant 0 : i32
    return %1, %c0_i32 : i32, i32
  }
  func.func @transform_1(%arg0: i32, %arg1: i32) -> (i32, i32) {
    %c1_i32 = arith.constant 1 : i32
    %0 = arith.muli %arg0, %c1_i32 : i32
    %1 = arith.addi %0, %arg1 : i32
    %c0_i32 = arith.constant 0 : i32
    %c0_i32_0 = arith.constant 0 : i32
    return %1, %c0_i32 : i32, i32
  }
  func.func @transform_2(%arg0: i32, %arg1: i32) -> (i32, i32) {
    %c0_i32 = arith.constant 0 : i32
    %c0_i32_0 = arith.constant 0 : i32
    return %arg0, %c0_i32 : i32, i32
  }
  func.func @transform_3(%arg0: i32, %arg1: i32) -> (i32, i32) {
    %c0_i32 = arith.constant 0 : i32
    %c0_i32_0 = arith.constant 0 : i32
    return %arg0, %c0_i32 : i32, i32
  }
}

</mosaic_0001>

<bundles_post_ra>
// kernel: tpu_custom_call.1
= control target key start
LH: loop header
LB: loop body
LE: loop exit
PB: predicated region body
PF: predicated region fallthrough
CT: control target
= control target key end

     0   :  { %9 = vsyncpa [#allocation3], 0  ;;  %s307_s0 = inlined_call_operand.hbm [shape: f32[16,128], index: 0, kind: input, shape index: {}]   ;;  %s308_s1 = inlined_call_operand.hbm [shape: f32[16,128], index: 1, kind: input, shape index: {}]   ;;  %s309_s2 = inlined_call_operand.hbm [shape: f32[16,128], index: 2, kind: output, shape index: {0}]   ;;  %s310_s3 = inlined_call_operand.hbm [shape: f32[16,128], index: 3, kind: output, shape index: {1}]  }
   0x1   :  { %10 = vsyncpa [#allocation6], 0 }
   0x2   :  { %11 = vsyncpa [#allocation4], 0 }
   0x3   :  { %12 = vsyncpa [#allocation9], 0  ;;  %s220_s12 = smov [#allocation2]   ;;  %s124_s16 = scalar_lea.hbm %s307_s0, 256 }
   0x4   :  { %s22_s13 = sshll.u32 %s220_s12, 4  ;;  %p125_p0 = scmp.ne.s32.totalorder %s307_s0, %s124_s16  ;;  %s23_s13 = int_to_ptr.vmem [resolvable:$true] %s22_s13 }
   0x5   :  { %p128_p1 = scmp.lt.u32.totalorder %s124_s16, %s307_s0 }
   0x7   :  { %p130_p2 = pnand %p128_p1, %p125_p0 }
   0x9   :  { %133 = shalt.err (!%p130_p2)
}
   0xa   :  { %s134_s21 = scalar_lea.vmem %s23_s13, 256  ;;  %p139_p4 = scmp.lt.s32.totalorder %s23_s13, %s23_s13 }
   0xb   :  { %p135_p3 = scmp.ne.s32.totalorder %s23_s13, %s134_s21  ;;  %p140_p5 = scmp.lt.s32.totalorder %s134_s21, %s134_s21 }
   0xd   :  { %p141_p6 = por %p140_p5, %p139_p4 }
   0xf   :  { %p142_p7 = pnand %p141_p6, %p135_p3 }
  0x11   :  { %145 = shalt.err (!%p142_p7)
}
  0x12   :  { %s221_s22 = smov 128   ;;  %s222_s23 = smov 8  }
  0x13   :  { %28 = dma.hbm_to_vmem [thread:$0]  %s307_s0, 256, %s23_s13, [#allocation3], %s221_s22, %s221_s22, %s222_s23  }
  0x14   :  { %s223_s26 = smov [#allocation5]   ;;  %s146_s30 = scalar_lea.hbm %s308_s1, 256 }
  0x15   :  { %s38_s27 = sshll.u32 %s223_s26, 4  ;;  %p147_p8 = scmp.ne.s32.totalorder %s308_s1, %s146_s30  ;;  %s39_s27 = int_to_ptr.vmem [resolvable:$true] %s38_s27 }
  0x16   :  { %p150_p9 = scmp.lt.u32.totalorder %s146_s30, %s308_s1 }
  0x18   :  { %p152_p10 = pnand %p150_p9, %p147_p8 }
  0x1a   :  { %155 = shalt.err (!%p152_p10)
}
  0x1b   :  { %s156_s8 = scalar_lea.vmem %s39_s27, 256  ;;  %p161_p12 = scmp.lt.s32.totalorder %s39_s27, %s39_s27 }
  0x1c   :  { %p157_p11 = scmp.ne.s32.totalorder %s39_s27, %s156_s8  ;;  %p162_p13 = scmp.lt.s32.totalorder %s156_s8, %s156_s8 }
  0x1e   :  { %p163_p0 = por %p162_p13, %p161_p12 }
  0x20   :  { %p164_p1 = pnand %p163_p0, %p157_p11 }
  0x22   :  { %167 = shalt.err (!%p164_p1)
}
  0x23   :  { %44 = dma.hbm_to_vmem [thread:$0]  %s308_s1, 256, %s39_s27, [#allocation6], %s221_s22, %s221_s22, %s222_s23  }
  0x24   :  { %212 = dma.done.wait [#allocation3], 256  }
  0x25   :  { %213 = vsyncadd [#allocation3], 4294967040 }
  0x26   :  { %214 = dma.done.wait [#allocation6], 256  }
  0x27   :  { %215 = vsyncadd [#allocation6], 4294967040  ;;  %s224_s10 = smov [#allocation8]   ;;  %v225_v0 = vmov 1.0  }
  0x28   :  { %s100_s11 = sshll.u32 %s224_s10, 4  ;;  %81 = vst [vmem:[#allocation8] sm:$0xff] %v225_v0  ;;  %82 = vst [vmem:[#allocation8 + $0x8] sm:$0xff] %v225_v0  ;;  %s101_s11 = int_to_ptr.vmem [resolvable:$true] %s100_s11 }
  0x29   :  { %s168_s12 = scalar_lea.vmem %s101_s11, 256  ;;  %p173_p3 = scmp.lt.s32.totalorder %s101_s11, %s101_s11 }
  0x2a   :  { %p169_p2 = scmp.ne.s32.totalorder %s101_s11, %s168_s12  ;;  %p174_p4 = scmp.lt.s32.totalorder %s168_s12, %s168_s12 }
  0x2c   :  { %p175_p5 = por %p174_p4, %p173_p3 }
  0x2e   :  { %p176_p6 = pnand %p175_p5, %p169_p2 }
  0x30   :  { %179 = shalt.err (!%p176_p6)
}
  0x31   :  { %s180_s1 = scalar_lea.hbm %s310_s3, 256 }
  0x32   :  { %p181_p7 = scmp.ne.s32.totalorder %s310_s3, %s180_s1  ;;  %p184_p8 = scmp.lt.u32.totalorder %s180_s1, %s310_s3 }
  0x34   :  { %p186_p9 = pnand %p184_p8, %p181_p7 }
  0x36   :  { %189 = shalt.err (!%p186_p9)
}
  0x37   :  { %106 = dma.vmem_to_hbm [thread:$0]  %s101_s11, 256, %s310_s3, [#allocation9], %s221_s22, %s221_s22, %s222_s23   ;;  %v63_v1 = vld [vmem:[#allocation2] sm:$0xff]  ;;  %v65_v2 = vld [vmem:[#allocation5] sm:$0xff]  ;;  %v64_v3 = vld [vmem:[#allocation2 + $0x8] sm:$0xff] }
  0x38   :  { %v67_v4 = vsub.f32 %v63_v1, %v65_v2  ;;  %v66_v5 = vld [vmem:[#allocation5 + $0x8] sm:$0xff]  ;;  %s226_s21 = smov [#allocation7]  }
  0x39   :  { %v68_v6 = vsub.f32 %v64_v3, %v66_v5  ;;  %s88_s24 = sshll.u32 %s226_s21, 4  ;;  %s89_s24 = int_to_ptr.vmem [resolvable:$true] %s88_s24 }
  0x3a   :  { %v69_v7 = vand.u32 2147483647, %v67_v4  ;;  %s190_s25 = scalar_lea.vmem %s89_s24, 256  ;;  %p195_p11 = scmp.lt.s32.totalorder %s89_s24, %s89_s24 }
  0x3b   :  { %v70_v8 = vand.u32 2147483647, %v68_v6  ;;  %p191_p10 = scmp.ne.s32.totalorder %s89_s24, %s190_s25  ;;  %p196_p12 = scmp.lt.s32.totalorder %s190_s25, %s190_s25 }
  0x3c   :  { %75 = vst [vmem:[#allocation7] sm:$0xff] %v69_v7 }
  0x3d   :  { %76 = vst [vmem:[#allocation7 + $0x8] sm:$0xff] %v70_v8  ;;  %p197_p13 = por %p196_p12, %p195_p11 }
  0x3f   :  { %p198_p0 = pnand %p197_p13, %p191_p10 }
  0x41   :  { %201 = shalt.err (!%p198_p0)
}
  0x42   :  { %s202_s27 = scalar_lea.hbm %s309_s2, 256 }
  0x43   :  { %p203_p1 = scmp.ne.s32.totalorder %s309_s2, %s202_s27  ;;  %p206_p2 = scmp.lt.u32.totalorder %s202_s27, %s309_s2 }
  0x45   :  { %p208_p3 = pnand %p206_p2, %p203_p1 }
  0x47   :  { %211 = shalt.err (!%p208_p3)
}
  0x48   :  { %94 = dma.vmem_to_hbm [thread:$0]  %s89_s24, 256, %s309_s2, [#allocation4], %s221_s22, %s221_s22, %s222_s23  }
  0x49   :  { %216 = dma.done.wait [#allocation4], 256  }
  0x4a   :  { %217 = vsyncadd [#allocation4], 4294967040 }
  0x4b   :  { %218 = dma.done.wait [#allocation9], 256  }
  0x4c   :  { %219 = vsyncadd [#allocation9], 4294967040 }
  0x4d   :  { %113 = vsyncpa [#allocation3], 1 }
  0x4e   :  { %114 = vsyncpa [#allocation6], 1 }
  0x4f   :  { %115 = vsyncpa [#allocation4], 1 }
  0x50   :  { %116 = vsyncpa [#allocation9], 1 }

</bundles_post_ra>
